<compile_context>
chip_gen: v7x
topology: tpu7x:2x2x1
jax: 0.10.0
libtpu: 0.0.40
codegen_flags: <defaults>
</compile_context>

<pallas_src>
import functools

import jax
import jax.numpy as jnp
from jax.experimental import pallas as pl
from jax.experimental.pallas import tpu as pltpu


# ---------------------------------------------------------------------------
# Pallas kernel: fused stem-matmul + BN + SiLU + pooled accumulator + head
# ---------------------------------------------------------------------------
def enetv2_kernel(patches_ref,    # VMEM (1, P_TILE, K)  bf16  im2col'd input tile (K = 36, unpadded)
                  w_stem_ref,     # VMEM (K, C)          bf16  flattened conv-stem weight
                  bn_scale_ref,   # VMEM (1, C)          f32
                  bn_shift_ref,   # VMEM (1, C)          f32
                  drop_ref,       # VMEM (1, 1, C)       f32   combined dropout*pool factor
                  w_fc_ref,       # VMEM (C, D_pad)      bf16  myfc weight (transposed, lane-padded)
                  b_fc_ref,       # VMEM (1, D_pad)      f32   myfc bias (lane-padded)
                  out_ref,        # VMEM (1, 1, D_pad)   f32
                  pool_acc_ref):  # VMEM scratch (8, C)  f32   per-sublane running pooled sums
    p = pl.program_id(1)

    # ---- init the pooled-sum accumulator at the first spatial tile of this row ----
    @pl.when(p == 0)
    def _():
        pool_acc_ref[...] = jnp.zeros_like(pool_acc_ref)

    # ---- conv stem as an im2col matmul (bf16 MXU inputs, f32 accumulate) ----
    x = patches_ref[0]                                            # (P_TILE, K) bf16
    f = jnp.dot(x, w_stem_ref[...],
                preferred_element_type=jnp.float32)               # (P_TILE, C) f32

    # ---- folded BatchNorm affine + SiLU (f32 elementwise) ----
    f = f * bn_scale_ref[...] + bn_shift_ref[...]
    # sigmoid(x) = 0.5*(tanh(x/2)+1): tanh goes to the EUP, no VALU divide.
    f = f * (0.5 * (jnp.tanh(0.5 * f) + 1.0))

    # ---- running global-average-pool partial sum (VALU-only per step) ----
    pt, c = f.shape
    if pt % 8 == 0:
        partial = f.reshape(pt // 8, 8, c).sum(axis=0)            # (8, C), pure VALU adds
    else:
        # rare full-extent fallback tile: pay one XLU reduce, pad to 8 rows
        partial = jnp.concatenate(
            [jnp.sum(f, axis=0, keepdims=True),
             jnp.zeros((7, c), jnp.float32)], axis=0)             # (8, C)
    pool_acc_ref[...] += partial

    # ---- finalize: collapsed 5x dropout + single bf16 head matmul, once per row ----
    @pl.when(p == pl.num_programs(1) - 1)
    def _():
        pooled = jnp.sum(pool_acc_ref[...], axis=0, keepdims=True)   # (1, C), one XLU reduce
        # drop factor already folds: keep-count, 2x inverted-dropout, 1/5 avg, 1/P pool
        dropped = (pooled * drop_ref[0]).astype(jnp.bfloat16)        # (1, C) bf16
        h = jnp.dot(dropped, w_fc_ref[...],
                    preferred_element_type=jnp.float32) + b_fc_ref[...]   # (1, D_pad) f32
        out_ref[...] = h[None]                                       # (1, 1, D_pad)


# ---------------------------------------------------------------------------
# JAX glue: layout conversion, im2col, parameter prep, pallas_call
# ---------------------------------------------------------------------------
def _im2col_nhwc(x_nhwc, kh=3, kw=3, stride=2, pad=1):
    B, H, W, C = x_nhwc.shape
    xp = jnp.pad(x_nhwc, ((0, 0), (pad, pad), (pad, pad), (0, 0)))
    Ho = (H + 2 * pad - kh) // stride + 1
    Wo = (W + 2 * pad - kw) // stride + 1
    cols = []
    for i in range(kh):
        for j in range(kw):
            cols.append(xp[:, i:i + Ho * stride:stride, j:j + Wo * stride:stride, :])
    patches = jnp.stack(cols, axis=3)                             # (B, Ho, Wo, kh*kw, C)
    return patches.reshape(B, Ho * Wo, kh * kw * C), Ho, Wo


def _round_up(n, m):
    return ((n + m - 1) // m) * m


def _pick_p_tile(P, cap):
    """Largest divisor of P that is <= cap and sublane-aligned (prefer x16 for bf16)."""
    c = min(cap, P)
    for align in (16, 8):
        for d in range(c - c % align, 0, -align):
            if P % d == 0:
                return d
    # TODO(synk): full-extent fallback can pressure v7x VMEM for huge, oddly
    # sized P; padding P would require masking padded rows (BN shift + SiLU
    # makes them nonzero), so keep the exact fallback.
    return P


@functools.partial(jax.jit, static_argnames=("out_dim", "p_tile_cap"))
def enetv2_forward(x_nchw, params, drop_key, *, out_dim, p_tile_cap=1024):
    """x_nchw: (B, 4, H, W) float32 — same convention as the PyTorch module."""
    x_nhwc = jnp.transpose(x_nchw, (0, 2, 3, 1))                  # NCHW -> NHWC
    patches, _, _ = _im2col_nhwc(x_nhwc)                          # (B, P, K) f32, K = 36
    B, P, K = patches.shape
    p_tile = _pick_p_tile(P, p_tile_cap)
    num_p = P // p_tile

    w_stem4 = params["w_stem4"]                                   # (C, 4, 3, 3) torch layout
    C = w_stem4.shape[0]
    D_pad = _round_up(out_dim, 128)                               # lane-dense output vst

    # bf16 stem operands; K left at its natural 36 (contiguous, unpadded block)
    patches_bf = patches.astype(jnp.bfloat16)                     # (B, P, K) bf16
    w_stem_2d = jnp.transpose(w_stem4, (2, 3, 1, 0)).reshape(K, C)  # [ki, kj, cin] ordering
    w_stem_bf = w_stem_2d.astype(jnp.bfloat16)

    bn_scale = params["bn_scale"].reshape(1, C).astype(jnp.float32)
    bn_shift = params["bn_shift"].reshape(1, C).astype(jnp.float32)

    # lane-padded head params; w_fc resident in bf16 (single-pass MXU finalize)
    w_fc_p = jnp.pad(params["w_fc"].T, ((0, 0), (0, D_pad - out_dim))).astype(jnp.bfloat16)
    b_fc_p = jnp.pad(params["b_fc"], (0, D_pad - out_dim)).reshape(1, D_pad).astype(jnp.float32)

    # 5x Dropout(0.5) collapsed through the linear head (see header); fold 1/P too.
    keep = jax.random.bernoulli(drop_key, 0.5, (5, B, C)).astype(jnp.float32)
    drop_factor = (keep.sum(axis=0) * (2.0 / 5.0 / P)).reshape(B, 1, C)

    out3 = pl.pallas_call(
        enetv2_kernel,
        out_shape=jax.ShapeDtypeStruct((B, 1, D_pad), jnp.float32),
        grid=(B, num_p),
        in_specs=[
            pl.BlockSpec((1, p_tile, K), lambda b, p: (b, p, 0)),   # patches (dominant stream)
            pl.BlockSpec((K, C),         lambda b, p: (0, 0)),      # stem weight (grid-invariant)
            pl.BlockSpec((1, C),         lambda b, p: (0, 0)),      # bn scale
            pl.BlockSpec((1, C),         lambda b, p: (0, 0)),      # bn shift
            pl.BlockSpec((1, 1, C),      lambda b, p: (b, 0, 0)),   # dropout factor
            pl.BlockSpec((C, D_pad),     lambda b, p: (0, 0)),      # fc weight
            pl.BlockSpec((1, D_pad),     lambda b, p: (0, 0)),      # fc bias
        ],
        out_specs=pl.BlockSpec((1, 1, D_pad), lambda b, p: (b, 0, 0)),
        scratch_shapes=[pltpu.VMEM((8, C), jnp.float32)],
        compiler_params=pltpu.CompilerParams(
            # batch axis megacore-parallel; spatial axis MUST stay "arbitrary"
            # (pool scratch + output block are resident across it).
            # TODO(synk): when B == 1 on v7x, split the spatial axis across the
            # two TensorCores instead (two partial pool accumulators + combine).
            dimension_semantics=("parallel", "arbitrary"),
            vmem_limit_bytes=48 * 1024 * 1024,
        ),
    )(patches_bf, w_stem_bf, bn_scale, bn_shift, drop_factor, w_fc_p, b_fc_p)

    return out3.reshape(B, D_pad)[:, :out_dim]


def init_params(key, c_stem=128, out_dim=8):
    # NOTE: c_stem=128 maps perfectly to v5e's 128x128 MXU; use a multiple of
    # 256 on v6e/v7x if channel count ever becomes a real (non-synthetic) knob.
    k1, k2, k3, k4, k5 = jax.random.split(key, 5)
    # original timm conv_stem is 3-input-channel; enetv2 repeats it and slices to 4
    w_stem3 = jax.random.normal(k1, (c_stem, 3, 3, 3), jnp.float32) * 0.1
    w_stem4 = jnp.concatenate([w_stem3, w_stem3], axis=1)[:, :4]   # repeat(1,2,1,1)[:, :4]
    params = {
        "w_stem4": w_stem4,                                        # (C, 4, 3, 3)
        "bn_scale": 1.0 + 0.05 * jax.random.normal(k2, (c_stem,), jnp.float32),
        "bn_shift": 0.05 * jax.random.normal(k3, (c_stem,), jnp.float32),
        "w_fc": jax.random.normal(k4, (out_dim, c_stem), jnp.float32) * 0.05,
        "b_fc": jax.random.normal(k5, (out_dim,), jnp.float32) * 0.01,
    }
    return params


if __name__ == "__main__":
    key = jax.random.PRNGKey(0)
    kx, kp, kd = jax.random.split(key, 3)

    B, Cin, H, W = 2, 4, 16, 16
    out_dim = 8
    x = jax.random.normal(kx, (B, Cin, H, W), jnp.float32)         # NCHW, like PyTorch
    params = init_params(kp, c_stem=128, out_dim=out_dim)

    out = enetv2_forward(x, params, kd, out_dim=out_dim)
    out = jax.block_until_ready(out)

    assert out.shape == (B, out_dim)
    assert bool(jnp.all(jnp.isfinite(out)))
    print("KERNEL_OK")
</pallas_src>

<mosaic_0001>
module attributes {stable_mosaic.version = 11 : i64} {
  func.func @enetv2_kernel(%arg0: i32, %arg1: i32, %arg2: memref<1x64x36xbf16, #tpu.memory_space<vmem>>, %arg3: memref<36x128xbf16, #tpu.memory_space<vmem>>, %arg4: memref<1x128xf32, #tpu.memory_space<vmem>>, %arg5: memref<1x128xf32, #tpu.memory_space<vmem>>, %arg6: memref<1x1x128xf32, #tpu.memory_space<vmem>>, %arg7: memref<128x128xbf16, #tpu.memory_space<vmem>>, %arg8: memref<1x128xf32, #tpu.memory_space<vmem>>, %arg9: memref<1x1x128xf32, #tpu.memory_space<vmem>>, %arg10: memref<8x128xf32, #tpu.memory_space<vmem>>) attributes {dimension_semantics = [#tpu.dimension_semantics<parallel>, #tpu.dimension_semantics<arbitrary>], iteration_bounds = array<i64: 2, 1>, scalar_prefetch = 0 : i64, scratch_operands = 1 : i64, tpu.core_type = #tpu.core_type<tc>, window_params = [{transform_indices = @transform_0, window_bounds = array<i64: 1, 64, 36>}, {pipeline_mode = #tpu.pipeline_mode<synchronous>, transform_indices = @transform_1, window_bounds = array<i64: 36, 128>}, {pipeline_mode = #tpu.pipeline_mode<synchronous>, transform_indices = @transform_2, window_bounds = array<i64: 1, 128>}, {pipeline_mode = #tpu.pipeline_mode<synchronous>, transform_indices = @transform_3, window_bounds = array<i64: 1, 128>}, {transform_indices = @transform_4, window_bounds = array<i64: 1, 1, 128>}, {pipeline_mode = #tpu.pipeline_mode<synchronous>, transform_indices = @transform_5, window_bounds = array<i64: 128, 128>}, {pipeline_mode = #tpu.pipeline_mode<synchronous>, transform_indices = @transform_6, window_bounds = array<i64: 1, 128>}, {transform_indices = @transform_7, window_bounds = array<i64: 1, 1, 128>}]} {
    %c0_i32 = arith.constant 0 : i32
    %0 = arith.cmpi eq, %arg1, %c0_i32 : i32
    %1 = arith.extui %0 : i1 to i32
    %c0_i32_0 = arith.constant 0 : i32
    %2 = arith.cmpi ne, %1, %c0_i32_0 : i32
    scf.if %2 {
      %cst_19 = arith.constant 0.000000e+00 : f32
      %29 = vector.broadcast %cst_19 : f32 to vector<8x128xf32>
      %c0_20 = arith.constant 0 : index
      %c0_21 = arith.constant 0 : index
      %30 = vector.load %arg10[%c0_20, %c0_21] : memref<8x128xf32, #tpu.memory_space<vmem>>, vector<8x128xf32>
      tpu.vector_store %arg10[%c0_20, %c0_21], %29 {strides = array<i32>} : memref<8x128xf32, #tpu.memory_space<vmem>>, vector<8x128xf32>,
    } else {
    }
    %c0 = arith.constant 0 : index
    %c0_1 = arith.constant 0 : index
    %c0_2 = arith.constant 0 : index
    %3 = vector.load %arg2[%c0, %c0_1, %c0_2] : memref<1x64x36xbf16, #tpu.memory_space<vmem>>, vector<1x64x36xbf16>
    %4 = vector.shape_cast %3 : vector<1x64x36xbf16> to vector<64x36xbf16>
    %c0_3 = arith.constant 0 : index
    %c0_4 = arith.constant 0 : index
    %5 = vector.load %arg3[%c0_3, %c0_4] : memref<36x128xbf16, #tpu.memory_space<vmem>>, vector<36x128xbf16>
    %cst = arith.constant dense<0.000000e+00> : vector<64x128xf32>
    %6 = tpu.matmul %4, %5, %cst {dimension_numbers = #tpu.dot_dimension_numbers<[1], [0], [0], [1], [0, 0, 1, 1], [], []>} : vector<64x36xbf16>, vector<36x128xbf16>, vector<64x128xf32> -> vector<64x128xf32>
    %c0_5 = arith.constant 0 : index
    %c0_6 = arith.constant 0 : index
    %7 = vector.load %arg4[%c0_5, %c0_6] : memref<1x128xf32, #tpu.memory_space<vmem>>, vector<1x128xf32>
    %8 = vector.broadcast %7 : vector<1x128xf32> to vector<64x128xf32>
    %9 = arith.mulf %6, %8 : vector<64x128xf32>
    %c0_7 = arith.constant 0 : index
    %c0_8 = arith.constant 0 : index
    %10 = vector.load %arg5[%c0_7, %c0_8] : memref<1x128xf32, #tpu.memory_space<vmem>>, vector<1x128xf32>
    %11 = vector.broadcast %10 : vector<1x128xf32> to vector<64x128xf32>
    %12 = arith.addf %9, %11 : vector<64x128xf32>
    %cst_9 = arith.constant 5.000000e-01 : f32
    %13 = vector.broadcast %cst_9 : f32 to vector<64x128xf32>
    %14 = arith.mulf %13, %12 : vector<64x128xf32>
    %15 = math.tanh %14 : vector<64x128xf32>
    %cst_10 = arith.constant 1.000000e+00 : f32
    %16 = vector.broadcast %cst_10 : f32 to vector<64x128xf32>
    %17 = arith.addf %15, %16 : vector<64x128xf32>
    %cst_11 = arith.constant 5.000000e-01 : f32
    %18 = vector.broadcast %cst_11 : f32 to vector<64x128xf32>
    %19 = arith.mulf %18, %17 : vector<64x128xf32>
    %20 = arith.mulf %12, %19 : vector<64x128xf32>
    %21 = vector.shape_cast %20 : vector<64x128xf32> to vector<8x8x128xf32>
    %cst_12 = arith.constant dense<0.000000e+00> : vector<8x128xf32>
    %22 = vector.multi_reduction <add>, %21, %cst_12 [0] : vector<8x8x128xf32> to vector<8x128xf32>
    %c0_13 = arith.constant 0 : index
    %c0_14 = arith.constant 0 : index
    %23 = vector.load %arg10[%c0_13, %c0_14] : memref<8x128xf32, #tpu.memory_space<vmem>>, vector<8x128xf32>
    %24 = arith.addf %23, %22 : vector<8x128xf32>
    %c0_15 = arith.constant 0 : index
    %c0_16 = arith.constant 0 : index
    %25 = vector.load %arg10[%c0_15, %c0_16] : memref<8x128xf32, #tpu.memory_space<vmem>>, vector<8x128xf32>
    tpu.vector_store %arg10[%c0_15, %c0_16], %24 {strides = array<i32>} : memref<8x128xf32, #tpu.memory_space<vmem>>, vector<8x128xf32>,
    %c0_i32_17 = arith.constant 0 : i32
    %26 = arith.cmpi eq, %arg1, %c0_i32_17 : i32
    %27 = arith.extui %26 : i1 to i32
    %c0_i32_18 = arith.constant 0 : i32
    %28 = arith.cmpi ne, %27, %c0_i32_18 : i32
    scf.if %28 {
      %c0_19 = arith.constant 0 : index
      %c0_20 = arith.constant 0 : index
      %29 = vector.load %arg10[%c0_19, %c0_20] : memref<8x128xf32, #tpu.memory_space<vmem>>, vector<8x128xf32>
      %cst_21 = arith.constant dense<0.000000e+00> : vector<128xf32>
      %30 = vector.multi_reduction <add>, %29, %cst_21 [0] : vector<8x128xf32> to vector<128xf32>
      %31 = vector.shape_cast %30 : vector<128xf32> to vector<1x128xf32>
      %c0_22 = arith.constant 0 : index
      %c0_23 = arith.constant 0 : index
      %c0_24 = arith.constant 0 : index
      %32 = vector.load %arg6[%c0_22, %c0_23, %c0_24] : memref<1x1x128xf32, #tpu.memory_space<vmem>>, vector<1x1x128xf32>
      %33 = vector.shape_cast %32 : vector<1x1x128xf32> to vector<1x128xf32>
      %34 = arith.mulf %31, %33 : vector<1x128xf32>
      %35 = arith.truncf %34 : vector<1x128xf32> to vector<1x128xbf16>
      %c0_25 = arith.constant 0 : index
      %c0_26 = arith.constant 0 : index
      %36 = vector.load %arg7[%c0_25, %c0_26] : memref<128x128xbf16, #tpu.memory_space<vmem>>, vector<128x128xbf16>
      %cst_27 = arith.constant dense<0.000000e+00> : vector<1x128xf32>
      %37 = tpu.matmul %35, %36, %cst_27 {dimension_numbers = #tpu.dot_dimension_numbers<[1], [0], [0], [1], [0, 0, 1, 1], [], []>} : vector<1x128xbf16>, vector<128x128xbf16>, vector<1x128xf32> -> vector<1x128xf32>
      %c0_28 = arith.constant 0 : index
      %c0_29 = arith.constant 0 : index
      %38 = vector.load %arg8[%c0_28, %c0_29] : memref<1x128xf32, #tpu.memory_space<vmem>>, vector<1x128xf32>
      %39 = arith.addf %37, %38 : vector<1x128xf32>
      %40 = vector.shape_cast %39 : vector<1x128xf32> to vector<1x1x128xf32>
      %c0_30 = arith.constant 0 : index
      %c0_31 = arith.constant 0 : index
      %c0_32 = arith.constant 0 : index
      %41 = vector.load %arg9[%c0_30, %c0_31, %c0_32] : memref<1x1x128xf32, #tpu.memory_space<vmem>>, vector<1x1x128xf32>
      tpu.vector_store %arg9[%c0_30, %c0_31, %c0_32], %40 {strides = array<i32>} : memref<1x1x128xf32, #tpu.memory_space<vmem>>, vector<1x1x128xf32>,
    } else {
    }
    return
  }
  func.func @transform_0(%arg0: i32, %arg1: i32) -> (i32, i32, i32) {
    %c0_i32 = arith.constant 0 : i32
    %c0_i32_0 = arith.constant 0 : i32
    return %arg0, %arg1, %c0_i32 : i32, i32, i32
  }
  func.func @transform_1(%arg0: i32, %arg1: i32) -> (i32, i32) {
    %c0_i32 = arith.constant 0 : i32
    %c0_i32_0 = arith.constant 0 : i32
    %c0_i32_1 = arith.constant 0 : i32
    return %c0_i32, %c0_i32_0 : i32, i32
  }
  func.func @transform_2(%arg0: i32, %arg1: i32) -> (i32, i32) {
    %c0_i32 = arith.constant 0 : i32
    %c0_i32_0 = arith.constant 0 : i32
    %c0_i32_1 = arith.constant 0 : i32
    return %c0_i32, %c0_i32_0 : i32, i32
  }
  func.func @transform_3(%arg0: i32, %arg1: i32) -> (i32, i32) {
    %c0_i32 = arith.constant 0 : i32
    %c0_i32_0 = arith.constant 0 : i32
    %c0_i32_1 = arith.constant 0 : i32
    return %c0_i32, %c0_i32_0 : i32, i32
  }
  func.func @transform_4(%arg0: i32, %arg1: i32) -> (i32, i32, i32) {
    %c0_i32 = arith.constant 0 : i32
    %c0_i32_0 = arith.constant 0 : i32
    %c0_i32_1 = arith.constant 0 : i32
    return %arg0, %c0_i32, %c0_i32_0 : i32, i32, i32
  }
  func.func @transform_5(%arg0: i32, %arg1: i32) -> (i32, i32) {
    %c0_i32 = arith.constant 0 : i32
    %c0_i32_0 = arith.constant 0 : i32
    %c0_i32_1 = arith.constant 0 : i32
    return %c0_i32, %c0_i32_0 : i32, i32
  }
  func.func @transform_6(%arg0: i32, %arg1: i32) -> (i32, i32) {
    %c0_i32 = arith.constant 0 : i32
    %c0_i32_0 = arith.constant 0 : i32
    %c0_i32_1 = arith.constant 0 : i32
    return %c0_i32, %c0_i32_0 : i32, i32
  }
  func.func @transform_7(%arg0: i32, %arg1: i32) -> (i32, i32, i32) {
    %c0_i32 = arith.constant 0 : i32
    %c0_i32_0 = arith.constant 0 : i32
    %c0_i32_1 = arith.constant 0 : i32
    return %arg0, %c0_i32, %c0_i32_0 : i32, i32, i32
  }
}

</mosaic_0001>

<bundles_post_ra>
// kernel: enetv2_forward.1
= control target key start
LH: loop header
LB: loop body
LE: loop exit
PB: predicated region body
PF: predicated region fallthrough
CT: control target
= control target key end

     0   :  { %12 = vsyncpa [#allocation4], 0  ;;  %s1199_s0 = inlined_call_operand.vmem [shape: bf16[2,64,36], index: 0, kind: input, shape index: {}]   ;;  %s1200_s1 = inlined_call_operand.vmem [shape: bf16[36,128], index: 1, kind: input, shape index: {}]   ;;  %s1201_s2 = inlined_call_operand.vmem [shape: f32[1,128], index: 2, kind: input, shape index: {}]   ;;  %s1202_s3 = inlined_call_operand.vmem [shape: f32[1,128], index: 3, kind: input, shape index: {}]   ;;  %s1203_s4 = inlined_call_operand.vmem [shape: f32[2,1,128], index: 4, kind: input, shape index: {}]   ;;  %s1204_s5 = inlined_call_operand.vmem [shape: bf16[128,128], index: 5, kind: input, shape index: {}]   ;;  %s1205_s6 = inlined_call_operand.vmem [shape: f32[1,128], index: 6, kind: input, shape index: {}]   ;;  %s1206_s7 = inlined_call_operand.hbm [shape: f32[2,1,128], index: 7, kind: output, shape index: {}]  }
   0x1   :  { %14 = vsyncpa [#allocation4 + $0x1], 0  ;;  %s1038_s24 = smov 0   ;;  %s1040_s25 = smov 0  }
   0x2   :  { %s1042_s26 = smov 0   ;;  %s1044_s27 = smov 0  }
   0x3   :  { %s1046_s28 = smov 0   ;;  %s1048_s29 = smov 0  }
   0x4 LB: > { %s744_s30 = sadd.s32 4294967295, %s993_s29   ;;  %s745_s8 = sadd.s32 4294967294, %s993_s29   ;;  %s993_s29 = sphi %s1048_s29, %s20_s29   ;;  %s989_s28 = sphi %s1046_s28, %s1213_s28   ;;  %s985_s27 = sphi %s1044_s27, %s1212_s27   ;;  %s981_s26 = sphi %s1042_s26, %s1211_s26   ;;  %s977_s25 = sphi %s1040_s25, %s1210_s25   ;;  %s973_s24 = sphi %s1038_s24, %s1209_s24  }
   0x5   : > { %s32_s9 = sadd.s32 1, %s989_s28  ;;  %s198_s10 = sadd.s32 1, %s981_s26 }
   0x6   : > { %p34_p0 = scmp.ge.s32.totalorder %s32_s9, 2  ;;  %p208_p1 = scmp.ne.s32.totalorder %s981_s26, %s977_s25 }
   0x7   : > { %p209_p2 = scmp.eq.s32.totalorder %s744_s30, 1  ;;  %p214_p3 = scmp.ne.s32.totalorder %s977_s25, %s973_s24 }
   0x8   : > { %s1215_s9 = smov (%p34_p0, %s32_s9), 0  ;;  %p215_p5 = scmp.eq.s32.totalorder %s745_s8, 1 }
   0x9   : > { %p1078_p4 = por %p209_p2, %p208_p1  ;;  %s195_s12 = ssub.s32 %s989_s28, %s1215_s9 }
   0xa   : > { %p748_p6 = scmp.ge.s32.totalorder %s993_s29, 1  ;;  %p196_p7 = scmp.eq.s32.totalorder %s195_s12, 0 }
   0xb   : > { %p1085_p8 = por %p215_p5, %p214_p3  ;;  %p267_p9 = scmp.lt.s32.totalorder %s993_s29, 3 }
   0xc   : > { %s1091_s14 = scalar_select %p196_p7, %s981_s26, %s198_s10  }
   0xd   : > { %p268_p10 = pnand %p748_p6, %p267_p9 }
   0xe   : > { %v884_v0 = vld [vmem:[%s1200_s1] sm:$0xff] (!%p268_p10)   ;;  %v885_v1 = vld [vmem:[%s1200_s1 + $0x8] sm:$0xff] (!%p268_p10)   ;;  %p306_p11 = scmp.lt.s32.totalorder (!%p268_p10), %s985_s27, 1  ;;  %v886_v2 = vld [vmem:[%s1200_s1 + $0x10] ss:$0 sps:$4 sm:$0x33] (!%p268_p10)  }
   0xf   : > { %271 = sbr.rel (%p268_p10) target bundleno = 524 (0x20c), region = 48  ;;  %792 = vmatprep.subr.bf16.mxu0 (!%p268_p10), %v884_v0  ;;  %vm385_vm0 = vcmask (!%p268_p10), 1041408   ;;  %vm372_vm1 = vcmask (!%p268_p10), 293888   ;;  %v891_v8 = vld [vmem:[%s1204_s5] sm:$0xff] (!%p268_p10)   ;;  %v995_v9 = vmov (!%p268_p10), 0.0   ;;  %v892_v10 = vld [vmem:[%s1204_s5 + $0x8] sm:$0xff] (!%p268_p10)  }
  0x10   : > { %793 = vmatpush3.bf16.msra.mxu0 (!%p268_p10), %v884_v0  ;;  %v387_v4 = vsel (!%p268_p10), %vm385_vm0, %v886_v2, 0  ;;  %806 = vmatprep.subr.bf16.mxu1 (!%p268_p10), %v995_v9  ;;  %v893_v11 = vld [vmem:[%s1204_s5 + $0x10] sm:$0xff] (!%p268_p10)   ;;  %v894_v12 = vld [vmem:[%s1204_s5 + $0x18] sm:$0xff] (!%p268_p10)   ;;  %v895_v13 = vld [vmem:[%s1204_s5 + $0x20] sm:$0xff] (!%p268_p10)   ;;  %vm996_vm2 = vmmov (!%p268_p10), 0   ;;  %s772_s15 = sshll.u32 (!%p268_p10), %s985_s27, 4 }
  0x11   : > { %794 = vmatprep.subr.bf16.mxu0 (!%p268_p10), %v885_v1  ;;  %807 = vmatpush3.bf16.msra.mxu1 (!%p268_p10), %v891_v8  ;;  %v896_v14 = vld [vmem:[%s1204_s5 + $0x28] sm:$0xff] (!%p268_p10)   ;;  %v897_v15 = vld [vmem:[%s1204_s5 + $0x30] sm:$0xff] (!%p268_p10)   ;;  %v898_v16 = vld [vmem:[%s1204_s5 + $0x38] sm:$0xff] (!%p268_p10)   ;;  %s1152_s19 = scalar_lea.hbm (!%p268_p10), %s1206_s7, %s772_s15 }
  0x12   : > { %808 = vmatprep.subr.bf16.mxu1 (!%p268_p10), %v995_v9  ;;  %822 = vmatprep.mubr.msk.bf16.mxu1 (!%p268_p10), %vm996_vm2, %v995_v9  ;;  %v762_v17 = vld [vmem:[%s1201_s2] ss:$0 sm:$0xff] (!%p268_p10) }
  0x13   : > { %v763_v19 = vld [vmem:[%s1202_s3] ss:$0 sm:$0xff] (!%p268_p10) }
  0x14   : > { %795 = vmatpush3.bf16.msra.mxu0 (!%p268_p10), %v885_v1 }
  0x15   : > { %826 = vmatprep.subr.msk.bf16.mxu0 (!%p268_p10), %vm385_vm0, %v886_v2  ;;  %809 = vmatpush3.bf16.msra.mxu1 (!%p268_p10), %v892_v10 }
  0x16   : > { %s1104_s21 = scalar_select %p306_p11, %s985_s27, 1  ;;  %810 = vmatprep.subr.bf16.mxu1 %v995_v9 }
  0x18   : > { %s775_s22 = sshll.u32 %s1104_s21, 5  ;;  %797 = vmatpush3.bf16.msra.mxu0 %v387_v4  ;;  %s317_s30 = scalar_lea.vmem %s1203_s4, %s1104_s21 }
  0x19   : > { %s313_s8 = scalar_lea.vmem %s1199_s0, %s775_s22  ;;  %811 = vmatpush3.bf16.msra.mxu1 %v893_v11  ;;  %s997_s22 = smov [#allocation3]  }
  0x1a   : > { %v887_v3 = vld [vmem:[%s313_s8] sm:$0xff]   ;;  %v888_v5 = vld [vmem:[%s313_s8 + $0x8] sm:$0xff]   ;;  %v889_v6 = vld [vmem:[%s313_s8 + $0x10] sm:$0xff]   ;;  %812 = vmatprep.subr.bf16.mxu1 %v995_v9  ;;  %s919_s23 = sshll.u32 %s997_s22, 4  ;;  %s920_s23 = int_to_ptr.vmem [resolvable:$false] %s919_s23 }
  0x1b   : > { %798 = vmatprep.mubr.msk.bf16.mxu0 %vm372_vm1, %v887_v3  ;;  %v890_v7 = vld [vmem:[%s313_s8 + $0x18] sm:$0xff]   ;;  %s303_s8 = sand.u32 1, %s977_s25  }
  0x1c   : > { %799 = vmatmul.mubr.msk.bf16.vlgmr.msra.gmra.mrb[0].mxu0 %vm372_vm1, %v888_v5  ;;  %s304_s16 = scalar_lea.vmem [#allocation3], %s303_s8  ;;  %s654_s20 = scalar_lea.sflag [#allocation4], %s303_s8 }
  0x1d   : > { %802 = vmatprep.mubr.msk.bf16.mxu0 %vm372_vm1, %v889_v6  ;;  %813 = vmatpush3.bf16.msra.mxu1 %v894_v12  ;;  %s666_s17 = sshll.u32 %s304_s16, 4  ;;  %s1154_s17 = int_to_ptr.vmem [resolvable:$true] %s666_s17 }
  0x1e   : > { %814 = vmatprep.subr.bf16.mxu1 %v995_v9  ;;  %s915_s27 = scalar_lea.vmem %s1154_s17, 16  ;;  %p922_p1 = scmp.lt.s32.totalorder %s1154_s17, %s920_s23 }
  0x1f   : > { %p916_p12 = scmp.ne.s32.totalorder %s1154_s17, %s915_s27 }
  0x21   : > { %815 = vmatpush3.bf16.msra.mxu1 %v895_v13  ;;  %p917_p13 = pnand %p916_p12, %p1078_p4 }
  0x22   : > { %816 = vmatprep.subr.bf16.mxu1 %v995_v9 }
  0x23   : > { %p918_p0 = pneg %p917_p13 }
  0x24   : > { %803 = vmatmul.mubr.msk.bf16.gmra.mrb[4].mxu0 %vm372_vm1, %v890_v7 }
  0x25   : > { %817 = vmatpush3.bf16.msra.mxu1 %v896_v14 }
  0x26   : > { %818 = vmatprep.subr.bf16.mxu1 %v995_v9 }
  0x29   : > { %819 = vmatpush3.bf16.msra.mxu1 %v897_v15 }
  0x2a   : > { %820 = vmatprep.subr.bf16.mxu1 %v995_v9 }
  0x2d   : > { %821 = vmatpush3.bf16.msra.mxu1 %v898_v16 }
  0xef   : > { %v800_v18 = vpop.f32.mrb[0].mxu0 }
  0xf0   : > { %v463_v20 = vmul.f32 %v800_v18, %v762_v17  ;;  %v423_v21 = vpop.f32.mrb[1].mxu0 }
  0xf1   : > { %v461_v22 = vmul.f32 %v762_v17, %v423_v21  ;;  %v801_v23 = vpop.f32.mrb[2].mxu0 }
  0xf2   : > { %v478_v24 = vadd.f32 %v763_v19, %v463_v20  ;;  %v464_v25 = vmul.f32 %v801_v23, %v762_v17  ;;  %v426_v26 = vpop.f32.mrb[3].mxu0 }
  0xf3   : > { %v476_v27 = vadd.f32 %v763_v19, %v461_v22  ;;  %v462_v28 = vmul.f32 %v762_v17, %v426_v26 }
  0xf4   : > { %v486_v29 = vmul.f32 0.5, %v478_v24  ;;  %v479_v30 = vadd.f32 %v763_v19, %v464_v25 }
  0xf5   : > { %v484_v31 = vmul.f32 0.5, %v476_v27  ;;  %v477_v32 = vadd.f32 %v763_v19, %v462_v28 }
  0xf6   : > { %899 = vtanh.f32 %v486_v29  ;;  %v487_v33 = vmul.f32 0.5, %v479_v30 }
  0xf7   : > { %901 = vtanh.f32 %v484_v31  ;;  %v485_v34 = vmul.f32 0.5, %v477_v32  ;;  %v804_v35 = vpop.f32.mrb[4].mxu0  ;;  %v544_v31 = vld [vmem:[%s317_s30] sm:$0x1]  ;;  %s921_s30 = scalar_lea.vmem %s920_s23, 32 }
  0xf8   : > { %903 = vtanh.f32 %v487_v33  ;;  %v467_v36 = vmul.f32 %v804_v35, %v762_v17  ;;  %v439_v37 = vpop.f32.mrb[5].mxu0  ;;  %v563_v35 = vld [vmem:[%s1205_s6] sm:$0x1]  ;;  %p923_p2 = scmp.lt.s32.totalorder %s921_s30, %s915_s27 }
  0xf9   : > { %905 = vtanh.f32 %v485_v34  ;;  %v465_v38 = vmul.f32 %v762_v17, %v439_v37  ;;  %v805_v39 = vpop.f32.mrb[6].mxu0 }
  0xfa   : > { %v482_v40 = vadd.f32 %v763_v19, %v467_v36  ;;  %v468_v41 = vmul.f32 %v805_v39, %v762_v17  ;;  %v442_v42 = vpop.f32.mrb[7].mxu0  ;;  %p924_p3 = por %p923_p2, %p922_p1 }
  0xfb   : > { %v480_v43 = vadd.f32 %v763_v19, %v465_v38  ;;  %v466_v44 = vmul.f32 %v762_v17, %v442_v42 }
  0xfc   : > { %v490_v45 = vmul.f32 0.5, %v482_v40  ;;  %v483_v46 = vadd.f32 %v763_v19, %v468_v41  ;;  %p925_p5 = pnand %p924_p3, %p918_p0 }
  0xfd   : > { %v488_v47 = vmul.f32 0.5, %v480_v43  ;;  %v481_v48 = vadd.f32 %v763_v19, %v466_v44 }
  0xfe   : > { %907 = vtanh.f32 %v490_v45  ;;  %v491_v49 = vmul.f32 0.5, %v483_v46 }
  0xff   : > { %909 = vtanh.f32 %v488_v47  ;;  %v489_v50 = vmul.f32 0.5, %v481_v48 }
 0x100   : > { %v900_v51 = vpop.eup %899  ;;  %911 = vtanh.f32 %v491_v49 }
 0x101   : > { %v902_v52 = vpop.eup %901  ;;  %913 = vtanh.f32 %v489_v50  ;;  %v502_v54 = vadd.f32 1.0, %v900_v51 }
 0x102   : > { %v904_v53 = vpop.eup %903  ;;  %v500_v55 = vadd.f32 1.0, %v902_v52 }
 0x103   : > { %v906_v56 = vpop.eup %905  ;;  %v503_v57 = vadd.f32 1.0, %v904_v53  ;;  %v510_v60 = vmul.f32 0.5, %v502_v54 }
 0x104   : > { %v508_v58 = vmul.f32 0.5, %v500_v55  ;;  %v501_v59 = vadd.f32 1.0, %v906_v56 }
 0x105   : > { %v511_v62 = vmul.f32 0.5, %v503_v57  ;;  %v518_v4 = vmul.f32 %v510_v60, %v478_v24 }
 0x106   : > { %v509_v61 = vmul.f32 0.5, %v501_v59  ;;  %v516_v0 = vmul.f32 %v508_v58, %v476_v27 }
 0x107   : > { %v519_v9 = vmul.f32 %v511_v62, %v479_v30 }
 0x108   : > { %v908_v63 = vpop.eup %907  ;;  %v517_v1 = vmul.f32 %v509_v61, %v477_v32 }
 0x109   : > { %v910_v2 = vpop.eup %909  ;;  %v506_v6 = vadd.f32 1.0, %v908_v63 }
 0x10a   : > { %v912_v3 = vpop.eup %911  ;;  %v524_v5 = vadd.f32 %v517_v1, %v516_v0  ;;  %v504_v7 = vadd.f32 1.0, %v910_v2 }
 0x10b   : > { %v914_v8 = vpop.eup %913  ;;  %v507_v12 = vadd.f32 1.0, %v912_v3  ;;  %v514_v14 = vmul.f32 0.5, %v506_v6 }
 0x10c   : > { %v525_v10 = vadd.f32 %v524_v5, %v518_v4  ;;  %v512_v11 = vmul.f32 0.5, %v504_v7  ;;  %v505_v13 = vadd.f32 1.0, %v914_v8 }
 0x10d   : > { %v515_v19 = vmul.f32 0.5, %v507_v12  ;;  %v522_v21 = vmul.f32 %v514_v14, %v482_v40 }
 0x10e   : > { %v520_v15 = vmul.f32 %v512_v11, %v480_v43  ;;  %v526_v16 = vadd.f32 %v525_v10, %v519_v9  ;;  %v513_v17 = vmul.f32 0.5, %v505_v13 }
 0x10f   : > { %v523_v23 = vmul.f32 %v515_v19, %v483_v46 }
 0x110   : > { %v527_v18 = vadd.f32 %v526_v16, %v520_v15  ;;  %v521_v20 = vmul.f32 %v513_v17, %v481_v48 }
 0x112   : > { %v528_v22 = vadd.f32 %v527_v18, %v521_v20 }
 0x114   : > { %v529_v24 = vadd.f32 %v528_v22, %v522_v21 }
 0x116   : > { %v530_v25 = vadd.f32 %v529_v24, %v523_v23 }
 0x118   : > { %v538_v26 = vrot.slane %v530_v25, 4 }
 0x11a   : > { %v539_v27 = vadd.f32 %v538_v26, %v530_v25 }
 0x11c   : > { %v540_v28 = vrot.slane %v539_v27, 2 }
 0x11e   : > { %v541_v29 = vadd.f32 %v540_v28, %v539_v27 }
 0x120   : > { %v542_v30 = vrot.slane %v541_v29, 1 }
 0x122   : > { %v543_v32 = vadd.f32 %v542_v30, %v541_v29 }
 0x124   : > { %v545_v33 = vmul.f32 %v544_v31, %v543_v32 }
 0x126   : > { %v546_v34 = vpack.c.bf16 %v545_v33, %v545_v33 }
 0x128   : > { %823 = vmatmul.mubr.bf16.vlgmr.msra.gmra.mrb[0].mxu1 %v546_v34 }
 0x1fb   : > { %v646_v36 = vpop.f32.mrb[0].mxu1 }
 0x1fc   : > { %v647_v37 = vadd.f32 %v646_v36, %v563_v35  ;;  %v824_v38 = vpop.f32.mrb[1].mxu1 }
 0x1fd   : > { %v649_v39 = vpop.f32.mrb[2].mxu1 }
 0x1fe   : > { %652 = vst [vmem:[%s304_s16] sm:$0x1] %v647_v37  ;;  %v825_v40 = vpop.f32.mrb[3].mxu1 }
 0x1ff   : > { %928 = shalt.err (!%p925_p5)
}
 0x200   : > { %s929_s8 = scalar_lea.hbm %s1152_s19, 16  ;;  %s933_s15 = scalar_lea.hbm %s1206_s7, 32 }
 0x201   : > { %p930_p6 = scmp.ne.s32.totalorder %s1152_s19, %s929_s8  ;;  %p934_p10 = scmp.lt.u32.totalorder %s1152_s19, %s1206_s7 }
 0x202   : > { %p935_p11 = scmp.lt.u32.totalorder %s933_s15, %s929_s8  ;;  %p937_p13 = scmp.lt.u32.totalorder %s929_s8, %s1152_s19 }
 0x203   : > { %p931_p7 = pnand %p930_p6, %p1078_p4 }
 0x204   : > { %p936_p12 = por %p935_p11, %p934_p10 }
 0x205   : > { %p932_p9 = pneg %p931_p7 }
 0x206   : > { %p938_p0 = por %p937_p13, %p936_p12 }
 0x208   : > { %p939_p1 = pnand %p938_p0, %p932_p9 }
 0x20a   : > { %942 = shalt.err (!%p939_p1)
}
 0x20b   : > { %827 = dma.vmem_to_hbm [thread:$0]  (%p1078_p4), %s1154_s17, 16, %s1152_s19, %s654_s20  }
 0x20c PF: > { %p833_p2 = scmp.ge.s32.totalorder %s993_s29, 2  ;;  %s678_s18 = sand.u32 1, %s973_s24  }
 0x20d   : > { %s679_s27 = scalar_lea.sflag [#allocation4], %s678_s18 }
 0x20e   : > { %p830_p3 = pnand %p833_p2, %p1085_p8 }
 0x210   : > { %968 = dma.done.wait (!%p830_p3), %s679_s27, 16  }
 0x211   : > { %970 = vsyncadd (!%p830_p3), %s679_s27, 4294967280  ;;  %s20_s29 = sadd.s32 1, %s993_s29   ;;  %s1209_s24 = smov %s977_s25 }
 0x212   : > { %p17_p5 = scmp.ge.s32.totalorder %s20_s29, 4   ;;  %s1210_s25 = smov %s981_s26 }
 0x213   : > { %s1211_s26 = smov %s1091_s14  ;;  %s1212_s27 = smov %s989_s28 }
 0x214   : > { %s1213_s28 = smov %s1215_s9  ;;  %19 = sbr.rel (!%p17_p5) target bundleno = 4 (0x4), region = 94 }
 0x21b   :  { %683 = vsyncpa [#allocation4], 1 }
 0x21c   :  { %685 = vsyncpa [#allocation4 + $0x1], 1 }

</bundles_post_ra>
